<compile_context>
chip_gen: v7x
topology: tpu7x:2x2x1
jax: 0.10.0
libtpu: 0.0.40
codegen_flags: <defaults>
</compile_context>

<pallas_src>
import functools

import jax
import jax.numpy as jnp
import numpy as np
from jax.experimental import pallas as pl
from jax.experimental.pallas import tpu as pltpu


def _embed_add_pos_kernel(ids_ref, tok_tbl_ref, pos_tbl_ref, pos_pad_ref, out_ref,
                          *, padding_idx):
    """Fused token-embedding gather + learned-positional-embedding add.

    ids_ref:     (B, tS, 1)  int32   token ids for this seq tile (all batch rows)
    tok_tbl_ref: (Vt, tD)    f32     full token-embedding vocab, this dim tile
    pos_tbl_ref: (tS, tD)    f32     positional rows for this seq tile, in
                                     position order (pre-flipped for left_pad)
    pos_pad_ref: (1, tD)     f32     pos_table[padding_idx], this dim tile
    out_ref:     (B, tS, tD)
    """
    ids = ids_ref[...]                                   # (B, tS, 1)
    tok_tbl = tok_tbl_ref[...]                           # (Vt, tD)
    vocab = tok_tbl.shape[0]

    # Token-embedding gather via an unrolled select chain over the tiny vocab:
    # exact (no MXU/bf16 rounding), pure VPU (idle in this memory-bound kernel).
    tok = jnp.broadcast_to(tok_tbl[0][None, None, :], out_ref.shape)
    for v in range(1, vocab):
        tok = jnp.where(ids == v, tok_tbl[v][None, None, :], tok)

    # Positional embedding: rows arrive already in position order (contiguous
    # table slice via the BlockSpec), broadcast over batch; padded tokens get
    # the explicit table[padding_idx] row (exact nn.Embedding semantics).
    pos = pos_tbl_ref[...][None, :, :]                   # (1, tS, tD)
    pad_row = pos_pad_ref[...][None, :, :]               # (1, 1, tD)
    pos_emb = jnp.where(ids == padding_idx, pad_row, pos)

    out_ref[...] = (tok + pos_emb).astype(out_ref.dtype)


def _largest_divisor_tile(n, multiple, cap):
    """Largest t <= cap with t % multiple == 0 and n % t == 0; falls back to n
    (full extent), which also satisfies the (8,128) BlockSpec rule."""
    best = 0
    t = multiple
    limit = min(n, cap)
    while t <= limit:
        if n % t == 0:
            best = t
        t += multiple
    return best if best > 0 else n


def sentence_decoder_embed(input_ids, token_table, pos_table, *, padding_idx,
                           left_pad=False, out_dtype=None):
    """x = token_table[input_ids] + LearnedPositionalEmbedding(input_ids).

    input_ids:   (B, S) int32, values in [0, Vt)
    token_table: (Vt, D) f32   -- SentenceDecoder.embedding weight
    pos_table:   (Vp, D) f32   -- positional_encoding.embedding weight (Vp >= S)
    returns:     (B, S, D)

    Positional semantics (matches the PyTorch module):
      positions = arange(S); if left_pad: positions = flip(positions)
      positions[input_ids == padding_idx] = padding_idx
      pos_emb = pos_table[positions]
    """
    B, S = input_ids.shape
    Vt, D = token_table.shape
    Vp, Dp = pos_table.shape
    assert D == Dp
    assert S <= Vp, "seq length must not exceed positional num_embeddings"
    assert 0 <= padding_idx < Vp and padding_idx < Vt
    out_dtype = token_table.dtype if out_dtype is None else out_dtype

    # Tile selection: lane-dense tD (multiple of 128, up to 512; full D fallback
    # when D has no 128-multiple divisor), tS multiple of 8 up to 512 (full S
    # fallback).  Cap the (B,tS,tD) output block at ~4 MiB per buffer so the
    # double-buffered footprint stays well inside v7x's 64 MiB VMEM.
    tD = _largest_divisor_tile(D, 128, 512)
    tS = _largest_divisor_tile(S, 8, 512)
    itemsize = jnp.dtype(out_dtype).itemsize
    while B * tS * tD * itemsize > 4 * 1024 * 1024 and tS > 8:
        smaller = _largest_divisor_tile(S, 8, tS // 2)
        if smaller >= tS:
            break
        tS = smaller

    # ids as (B, S, 1): pad/vocab compares broadcast along lanes, no relayout.
    ids3 = input_ids.astype(jnp.int32).reshape(B, S, 1)

    # Positional rows are a contiguous slice of the table; the kernel never
    # gathers.  Pass the full table when blocks line up (index_map only touches
    # rows [0, S)); otherwise (S not a multiple of 8, or left_pad) pre-slice /
    # pre-flip the tiny (S, D) slab once outside the kernel to keep the (8,128)
    # block constraint and keep the kernel a plain contiguous-tile reader.
    if (not left_pad) and tS % 8 == 0:
        pos_rows = pos_table
    else:
        pos_rows = pos_table[:S]
        if left_pad:
            pos_rows = pos_rows[::-1]

    pos_pad_row = pos_table[padding_idx:padding_idx + 1, :]          # (1, D)

    grid = (S // tS, D // tD)
    kernel = functools.partial(_embed_add_pos_kernel, padding_idx=padding_idx)

    return pl.pallas_call(
        kernel,
        out_shape=jax.ShapeDtypeStruct((B, S, D), out_dtype),
        grid=grid,
        in_specs=[
            pl.BlockSpec((B, tS, 1), lambda si, di: (0, si, 0)),      # ids
            pl.BlockSpec((Vt, tD), lambda si, di: (0, di)),           # token table
            pl.BlockSpec((tS, tD), lambda si, di: (si, di)),          # pos rows
            pl.BlockSpec((1, tD), lambda si, di: (0, di)),            # pos pad row
        ],
        out_specs=pl.BlockSpec((B, tS, tD), lambda si, di: (0, si, di)),
        compiler_params=pltpu.CompilerParams(
            dimension_semantics=("parallel", "parallel"),
            vmem_limit_bytes=32 * 1024 * 1024,
        ),
    )(ids3, token_table, pos_rows, pos_pad_row)


def _reference(input_ids, token_table, pos_table, *, padding_idx, left_pad):
    B, S = input_ids.shape
    tok = jnp.take(token_table, input_ids, axis=0)
    pos = jnp.arange(S, dtype=jnp.int32)
    if left_pad:
        pos = pos[::-1]
    pos = jnp.broadcast_to(pos[None, :], (B, S))
    pos = jnp.where(input_ids == padding_idx, padding_idx, pos)
    return tok + jnp.take(pos_table, pos, axis=0)


if __name__ == "__main__":
    # Shapes consistent with SentenceDecoder:
    #   Discourse_code_num -> token vocab, padding_idx = Discourse_code_num - 1,
    #   max_para_length    -> positional vocab, decoder_embed_dim = D,
    #   left_pad = False.
    discourse_code_num = 16       # Vt
    max_para_length = 16          # Vp
    decoder_embed_dim = 256       # D (multiple of 128 -> lane-dense stores)
    padding_idx = discourse_code_num - 1
    batch, seq = 2, 8

    key = jax.random.PRNGKey(0)
    k_ids, k_tok, k_pos = jax.random.split(key, 3)

    # nn.Embedding ~ N(0,1) with the padding row zeroed at init.
    tok_table = jax.random.normal(
        k_tok, (discourse_code_num, decoder_embed_dim), dtype=jnp.float32)
    tok_table = tok_table.at[padding_idx].set(0.0)
    pos_table = jax.random.normal(
        k_pos, (max_para_length, decoder_embed_dim), dtype=jnp.float32)
    pos_table = pos_table.at[padding_idx].set(0.0)

    # Deterministic ids with a few padding tokens to exercise the mask.
    input_ids = jax.random.randint(
        k_ids, (batch, seq), minval=0, maxval=discourse_code_num, dtype=jnp.int32)
    input_ids = input_ids.at[0, 0].set(padding_idx)
    input_ids = input_ids.at[1, 3].set(padding_idx)

    # SentenceDecoder uses left_pad=False; also check the left_pad=True path.
    for left_pad in (False, True):
        out = sentence_decoder_embed(
            input_ids, tok_table, pos_table,
            padding_idx=padding_idx, left_pad=left_pad)
        out = jax.block_until_ready(out)
        ref = _reference(input_ids, tok_table, pos_table,
                         padding_idx=padding_idx, left_pad=left_pad)
        np.testing.assert_array_equal(np.asarray(out), np.asarray(ref))

    print("KERNEL_OK")
</pallas_src>

<mosaic_0001>
module attributes {stable_mosaic.version = 11 : i64} {
  func.func @_embed_add_pos_kernel(%arg0: i32, %arg1: i32, %arg2: memref<2x8x1xi32, #tpu.memory_space<vmem>>, %arg3: memref<16x256xf32, #tpu.memory_space<vmem>>, %arg4: memref<8x256xf32, #tpu.memory_space<vmem>>, %arg5: memref<1x256xf32, #tpu.memory_space<vmem>>, %arg6: memref<2x8x256xf32, #tpu.memory_space<vmem>>) attributes {dimension_semantics = [#tpu.dimension_semantics<parallel>, #tpu.dimension_semantics<parallel>], iteration_bounds = array<i64: 1, 1>, scalar_prefetch = 0 : i64, scratch_operands = 0 : i64, tpu.core_type = #tpu.core_type<tc>, window_params = [{transform_indices = @transform_0, window_bounds = array<i64: 2, 8, 1>}, {transform_indices = @transform_1, window_bounds = array<i64: 16, 256>}, {transform_indices = @transform_2, window_bounds = array<i64: 8, 256>}, {transform_indices = @transform_3, window_bounds = array<i64: 1, 256>}, {transform_indices = @transform_4, window_bounds = array<i64: 2, 8, 256>}]} {
    %c0 = arith.constant 0 : index
    %c0_0 = arith.constant 0 : index
    %c0_1 = arith.constant 0 : index
    %0 = vector.load %arg2[%c0, %c0_0, %c0_1] : memref<2x8x1xi32, #tpu.memory_space<vmem>>, vector<2x8x1xi32>
    %c0_2 = arith.constant 0 : index
    %c0_3 = arith.constant 0 : index
    %1 = vector.load %arg3[%c0_2, %c0_3] : memref<16x256xf32, #tpu.memory_space<vmem>>, vector<16x256xf32>
    %2 = vector.extract_strided_slice %1 {offsets = [0, 0], sizes = [1, 256], strides = [1, 1]} : vector<16x256xf32> to vector<1x256xf32>
    %3 = vector.shape_cast %2 : vector<1x256xf32> to vector<256xf32>
    %4 = vector.shape_cast %3 : vector<256xf32> to vector<1x1x256xf32>
    %5 = vector.shape_cast %4 : vector<1x1x256xf32> to vector<1x1x256xf32>
    %6 = vector.broadcast %5 : vector<1x1x256xf32> to vector<2x8x256xf32>
    %c1_i32 = arith.constant 1 : i32
    %7 = vector.broadcast %c1_i32 : i32 to vector<2x8x1xi32>
    %8 = arith.cmpi eq, %0, %7 : vector<2x8x1xi32>
    %9 = vector.extract_strided_slice %1 {offsets = [1, 0], sizes = [1, 256], strides = [1, 1]} : vector<16x256xf32> to vector<1x256xf32>
    %10 = vector.shape_cast %9 : vector<1x256xf32> to vector<256xf32>
    %11 = vector.shape_cast %10 : vector<256xf32> to vector<1x1x256xf32>
    %12 = vector.shape_cast %8 : vector<2x8x1xi1> to vector<2x8x1xi1>
    %13 = vector.broadcast %12 : vector<2x8x1xi1> to vector<2x8x256xi1>
    %14 = vector.shape_cast %11 : vector<1x1x256xf32> to vector<1x1x256xf32>
    %15 = vector.broadcast %14 : vector<1x1x256xf32> to vector<2x8x256xf32>
    %16 = arith.select %13, %15, %6 : vector<2x8x256xi1>, vector<2x8x256xf32>
    %c2_i32 = arith.constant 2 : i32
    %17 = vector.broadcast %c2_i32 : i32 to vector<2x8x1xi32>
    %18 = arith.cmpi eq, %0, %17 : vector<2x8x1xi32>
    %19 = vector.extract_strided_slice %1 {offsets = [2, 0], sizes = [1, 256], strides = [1, 1]} : vector<16x256xf32> to vector<1x256xf32>
    %20 = vector.shape_cast %19 : vector<1x256xf32> to vector<256xf32>
    %21 = vector.shape_cast %20 : vector<256xf32> to vector<1x1x256xf32>
    %22 = vector.shape_cast %18 : vector<2x8x1xi1> to vector<2x8x1xi1>
    %23 = vector.broadcast %22 : vector<2x8x1xi1> to vector<2x8x256xi1>
    %24 = vector.shape_cast %21 : vector<1x1x256xf32> to vector<1x1x256xf32>
    %25 = vector.broadcast %24 : vector<1x1x256xf32> to vector<2x8x256xf32>
    %26 = arith.select %23, %25, %16 : vector<2x8x256xi1>, vector<2x8x256xf32>
    %c3_i32 = arith.constant 3 : i32
    %27 = vector.broadcast %c3_i32 : i32 to vector<2x8x1xi32>
    %28 = arith.cmpi eq, %0, %27 : vector<2x8x1xi32>
    %29 = vector.extract_strided_slice %1 {offsets = [3, 0], sizes = [1, 256], strides = [1, 1]} : vector<16x256xf32> to vector<1x256xf32>
    %30 = vector.shape_cast %29 : vector<1x256xf32> to vector<256xf32>
    %31 = vector.shape_cast %30 : vector<256xf32> to vector<1x1x256xf32>
    %32 = vector.shape_cast %28 : vector<2x8x1xi1> to vector<2x8x1xi1>
    %33 = vector.broadcast %32 : vector<2x8x1xi1> to vector<2x8x256xi1>
    %34 = vector.shape_cast %31 : vector<1x1x256xf32> to vector<1x1x256xf32>
    %35 = vector.broadcast %34 : vector<1x1x256xf32> to vector<2x8x256xf32>
    %36 = arith.select %33, %35, %26 : vector<2x8x256xi1>, vector<2x8x256xf32>
    %c4_i32 = arith.constant 4 : i32
    %37 = vector.broadcast %c4_i32 : i32 to vector<2x8x1xi32>
    %38 = arith.cmpi eq, %0, %37 : vector<2x8x1xi32>
    %39 = vector.extract_strided_slice %1 {offsets = [4, 0], sizes = [1, 256], strides = [1, 1]} : vector<16x256xf32> to vector<1x256xf32>
    %40 = vector.shape_cast %39 : vector<1x256xf32> to vector<256xf32>
    %41 = vector.shape_cast %40 : vector<256xf32> to vector<1x1x256xf32>
    %42 = vector.shape_cast %38 : vector<2x8x1xi1> to vector<2x8x1xi1>
    %43 = vector.broadcast %42 : vector<2x8x1xi1> to vector<2x8x256xi1>
    %44 = vector.shape_cast %41 : vector<1x1x256xf32> to vector<1x1x256xf32>
    %45 = vector.broadcast %44 : vector<1x1x256xf32> to vector<2x8x256xf32>
    %46 = arith.select %43, %45, %36 : vector<2x8x256xi1>, vector<2x8x256xf32>
    %c5_i32 = arith.constant 5 : i32
    %47 = vector.broadcast %c5_i32 : i32 to vector<2x8x1xi32>
    %48 = arith.cmpi eq, %0, %47 : vector<2x8x1xi32>
    %49 = vector.extract_strided_slice %1 {offsets = [5, 0], sizes = [1, 256], strides = [1, 1]} : vector<16x256xf32> to vector<1x256xf32>
    %50 = vector.shape_cast %49 : vector<1x256xf32> to vector<256xf32>
    %51 = vector.shape_cast %50 : vector<256xf32> to vector<1x1x256xf32>
    %52 = vector.shape_cast %48 : vector<2x8x1xi1> to vector<2x8x1xi1>
    %53 = vector.broadcast %52 : vector<2x8x1xi1> to vector<2x8x256xi1>
    %54 = vector.shape_cast %51 : vector<1x1x256xf32> to vector<1x1x256xf32>
    %55 = vector.broadcast %54 : vector<1x1x256xf32> to vector<2x8x256xf32>
    %56 = arith.select %53, %55, %46 : vector<2x8x256xi1>, vector<2x8x256xf32>
    %c6_i32 = arith.constant 6 : i32
    %57 = vector.broadcast %c6_i32 : i32 to vector<2x8x1xi32>
    %58 = arith.cmpi eq, %0, %57 : vector<2x8x1xi32>
    %59 = vector.extract_strided_slice %1 {offsets = [6, 0], sizes = [1, 256], strides = [1, 1]} : vector<16x256xf32> to vector<1x256xf32>
    %60 = vector.shape_cast %59 : vector<1x256xf32> to vector<256xf32>
    %61 = vector.shape_cast %60 : vector<256xf32> to vector<1x1x256xf32>
    %62 = vector.shape_cast %58 : vector<2x8x1xi1> to vector<2x8x1xi1>
    %63 = vector.broadcast %62 : vector<2x8x1xi1> to vector<2x8x256xi1>
    %64 = vector.shape_cast %61 : vector<1x1x256xf32> to vector<1x1x256xf32>
    %65 = vector.broadcast %64 : vector<1x1x256xf32> to vector<2x8x256xf32>
    %66 = arith.select %63, %65, %56 : vector<2x8x256xi1>, vector<2x8x256xf32>
    %c7_i32 = arith.constant 7 : i32
    %67 = vector.broadcast %c7_i32 : i32 to vector<2x8x1xi32>
    %68 = arith.cmpi eq, %0, %67 : vector<2x8x1xi32>
    %69 = vector.extract_strided_slice %1 {offsets = [7, 0], sizes = [1, 256], strides = [1, 1]} : vector<16x256xf32> to vector<1x256xf32>
    %70 = vector.shape_cast %69 : vector<1x256xf32> to vector<256xf32>
    %71 = vector.shape_cast %70 : vector<256xf32> to vector<1x1x256xf32>
    %72 = vector.shape_cast %68 : vector<2x8x1xi1> to vector<2x8x1xi1>
    %73 = vector.broadcast %72 : vector<2x8x1xi1> to vector<2x8x256xi1>
    %74 = vector.shape_cast %71 : vector<1x1x256xf32> to vector<1x1x256xf32>
    %75 = vector.broadcast %74 : vector<1x1x256xf32> to vector<2x8x256xf32>
    %76 = arith.select %73, %75, %66 : vector<2x8x256xi1>, vector<2x8x256xf32>
    %c8_i32 = arith.constant 8 : i32
    %77 = vector.broadcast %c8_i32 : i32 to vector<2x8x1xi32>
    %78 = arith.cmpi eq, %0, %77 : vector<2x8x1xi32>
    %79 = vector.extract_strided_slice %1 {offsets = [8, 0], sizes = [1, 256], strides = [1, 1]} : vector<16x256xf32> to vector<1x256xf32>
    %80 = vector.shape_cast %79 : vector<1x256xf32> to vector<256xf32>
    %81 = vector.shape_cast %80 : vector<256xf32> to vector<1x1x256xf32>
    %82 = vector.shape_cast %78 : vector<2x8x1xi1> to vector<2x8x1xi1>
    %83 = vector.broadcast %82 : vector<2x8x1xi1> to vector<2x8x256xi1>
    %84 = vector.shape_cast %81 : vector<1x1x256xf32> to vector<1x1x256xf32>
    %85 = vector.broadcast %84 : vector<1x1x256xf32> to vector<2x8x256xf32>
    %86 = arith.select %83, %85, %76 : vector<2x8x256xi1>, vector<2x8x256xf32>
    %c9_i32 = arith.constant 9 : i32
    %87 = vector.broadcast %c9_i32 : i32 to vector<2x8x1xi32>
    %88 = arith.cmpi eq, %0, %87 : vector<2x8x1xi32>
    %89 = vector.extract_strided_slice %1 {offsets = [9, 0], sizes = [1, 256], strides = [1, 1]} : vector<16x256xf32> to vector<1x256xf32>
    %90 = vector.shape_cast %89 : vector<1x256xf32> to vector<256xf32>
    %91 = vector.shape_cast %90 : vector<256xf32> to vector<1x1x256xf32>
    %92 = vector.shape_cast %88 : vector<2x8x1xi1> to vector<2x8x1xi1>
    %93 = vector.broadcast %92 : vector<2x8x1xi1> to vector<2x8x256xi1>
    %94 = vector.shape_cast %91 : vector<1x1x256xf32> to vector<1x1x256xf32>
    %95 = vector.broadcast %94 : vector<1x1x256xf32> to vector<2x8x256xf32>
    %96 = arith.select %93, %95, %86 : vector<2x8x256xi1>, vector<2x8x256xf32>
    %c10_i32 = arith.constant 10 : i32
    %97 = vector.broadcast %c10_i32 : i32 to vector<2x8x1xi32>
    %98 = arith.cmpi eq, %0, %97 : vector<2x8x1xi32>
    %99 = vector.extract_strided_slice %1 {offsets = [10, 0], sizes = [1, 256], strides = [1, 1]} : vector<16x256xf32> to vector<1x256xf32>
    %100 = vector.shape_cast %99 : vector<1x256xf32> to vector<256xf32>
    %101 = vector.shape_cast %100 : vector<256xf32> to vector<1x1x256xf32>
    %102 = vector.shape_cast %98 : vector<2x8x1xi1> to vector<2x8x1xi1>
    %103 = vector.broadcast %102 : vector<2x8x1xi1> to vector<2x8x256xi1>
    %104 = vector.shape_cast %101 : vector<1x1x256xf32> to vector<1x1x256xf32>
    %105 = vector.broadcast %104 : vector<1x1x256xf32> to vector<2x8x256xf32>
    %106 = arith.select %103, %105, %96 : vector<2x8x256xi1>, vector<2x8x256xf32>
    %c11_i32 = arith.constant 11 : i32
    %107 = vector.broadcast %c11_i32 : i32 to vector<2x8x1xi32>
    %108 = arith.cmpi eq, %0, %107 : vector<2x8x1xi32>
    %109 = vector.extract_strided_slice %1 {offsets = [11, 0], sizes = [1, 256], strides = [1, 1]} : vector<16x256xf32> to vector<1x256xf32>
    %110 = vector.shape_cast %109 : vector<1x256xf32> to vector<256xf32>
    %111 = vector.shape_cast %110 : vector<256xf32> to vector<1x1x256xf32>
    %112 = vector.shape_cast %108 : vector<2x8x1xi1> to vector<2x8x1xi1>
    %113 = vector.broadcast %112 : vector<2x8x1xi1> to vector<2x8x256xi1>
    %114 = vector.shape_cast %111 : vector<1x1x256xf32> to vector<1x1x256xf32>
    %115 = vector.broadcast %114 : vector<1x1x256xf32> to vector<2x8x256xf32>
    %116 = arith.select %113, %115, %106 : vector<2x8x256xi1>, vector<2x8x256xf32>
    %c12_i32 = arith.constant 12 : i32
    %117 = vector.broadcast %c12_i32 : i32 to vector<2x8x1xi32>
    %118 = arith.cmpi eq, %0, %117 : vector<2x8x1xi32>
    %119 = vector.extract_strided_slice %1 {offsets = [12, 0], sizes = [1, 256], strides = [1, 1]} : vector<16x256xf32> to vector<1x256xf32>
    %120 = vector.shape_cast %119 : vector<1x256xf32> to vector<256xf32>
    %121 = vector.shape_cast %120 : vector<256xf32> to vector<1x1x256xf32>
    %122 = vector.shape_cast %118 : vector<2x8x1xi1> to vector<2x8x1xi1>
    %123 = vector.broadcast %122 : vector<2x8x1xi1> to vector<2x8x256xi1>
    %124 = vector.shape_cast %121 : vector<1x1x256xf32> to vector<1x1x256xf32>
    %125 = vector.broadcast %124 : vector<1x1x256xf32> to vector<2x8x256xf32>
    %126 = arith.select %123, %125, %116 : vector<2x8x256xi1>, vector<2x8x256xf32>
    %c13_i32 = arith.constant 13 : i32
    %127 = vector.broadcast %c13_i32 : i32 to vector<2x8x1xi32>
    %128 = arith.cmpi eq, %0, %127 : vector<2x8x1xi32>
    %129 = vector.extract_strided_slice %1 {offsets = [13, 0], sizes = [1, 256], strides = [1, 1]} : vector<16x256xf32> to vector<1x256xf32>
    %130 = vector.shape_cast %129 : vector<1x256xf32> to vector<256xf32>
    %131 = vector.shape_cast %130 : vector<256xf32> to vector<1x1x256xf32>
    %132 = vector.shape_cast %128 : vector<2x8x1xi1> to vector<2x8x1xi1>
    %133 = vector.broadcast %132 : vector<2x8x1xi1> to vector<2x8x256xi1>
    %134 = vector.shape_cast %131 : vector<1x1x256xf32> to vector<1x1x256xf32>
    %135 = vector.broadcast %134 : vector<1x1x256xf32> to vector<2x8x256xf32>
    %136 = arith.select %133, %135, %126 : vector<2x8x256xi1>, vector<2x8x256xf32>
    %c14_i32 = arith.constant 14 : i32
    %137 = vector.broadcast %c14_i32 : i32 to vector<2x8x1xi32>
    %138 = arith.cmpi eq, %0, %137 : vector<2x8x1xi32>
    %139 = vector.extract_strided_slice %1 {offsets = [14, 0], sizes = [1, 256], strides = [1, 1]} : vector<16x256xf32> to vector<1x256xf32>
    %140 = vector.shape_cast %139 : vector<1x256xf32> to vector<256xf32>
    %141 = vector.shape_cast %140 : vector<256xf32> to vector<1x1x256xf32>
    %142 = vector.shape_cast %138 : vector<2x8x1xi1> to vector<2x8x1xi1>
    %143 = vector.broadcast %142 : vector<2x8x1xi1> to vector<2x8x256xi1>
    %144 = vector.shape_cast %141 : vector<1x1x256xf32> to vector<1x1x256xf32>
    %145 = vector.broadcast %144 : vector<1x1x256xf32> to vector<2x8x256xf32>
    %146 = arith.select %143, %145, %136 : vector<2x8x256xi1>, vector<2x8x256xf32>
    %c15_i32 = arith.constant 15 : i32
    %147 = vector.broadcast %c15_i32 : i32 to vector<2x8x1xi32>
    %148 = arith.cmpi eq, %0, %147 : vector<2x8x1xi32>
    %149 = vector.extract_strided_slice %1 {offsets = [15, 0], sizes = [1, 256], strides = [1, 1]} : vector<16x256xf32> to vector<1x256xf32>
    %150 = vector.shape_cast %149 : vector<1x256xf32> to vector<256xf32>
    %151 = vector.shape_cast %150 : vector<256xf32> to vector<1x1x256xf32>
    %152 = vector.shape_cast %148 : vector<2x8x1xi1> to vector<2x8x1xi1>
    %153 = vector.broadcast %152 : vector<2x8x1xi1> to vector<2x8x256xi1>
    %154 = vector.shape_cast %151 : vector<1x1x256xf32> to vector<1x1x256xf32>
    %155 = vector.broadcast %154 : vector<1x1x256xf32> to vector<2x8x256xf32>
    %156 = arith.select %153, %155, %146 : vector<2x8x256xi1>, vector<2x8x256xf32>
    %c0_4 = arith.constant 0 : index
    %c0_5 = arith.constant 0 : index
    %157 = vector.load %arg4[%c0_4, %c0_5] : memref<8x256xf32, #tpu.memory_space<vmem>>, vector<8x256xf32>
    %158 = vector.shape_cast %157 : vector<8x256xf32> to vector<1x8x256xf32>
    %c0_6 = arith.constant 0 : index
    %c0_7 = arith.constant 0 : index
    %159 = vector.load %arg5[%c0_6, %c0_7] : memref<1x256xf32, #tpu.memory_space<vmem>>, vector<1x256xf32>
    %160 = vector.shape_cast %159 : vector<1x256xf32> to vector<1x1x256xf32>
    %c15_i32_8 = arith.constant 15 : i32
    %161 = vector.broadcast %c15_i32_8 : i32 to vector<2x8x1xi32>
    %162 = arith.cmpi eq, %0, %161 : vector<2x8x1xi32>
    %163 = vector.shape_cast %162 : vector<2x8x1xi1> to vector<2x8x1xi1>
    %164 = vector.broadcast %163 : vector<2x8x1xi1> to vector<2x8x256xi1>
    %165 = vector.shape_cast %160 : vector<1x1x256xf32> to vector<1x1x256xf32>
    %166 = vector.broadcast %165 : vector<1x1x256xf32> to vector<2x8x256xf32>
    %167 = vector.shape_cast %158 : vector<1x8x256xf32> to vector<1x8x256xf32>
    %168 = vector.broadcast %167 : vector<1x8x256xf32> to vector<2x8x256xf32>
    %169 = arith.select %164, %166, %168 : vector<2x8x256xi1>, vector<2x8x256xf32>
    %170 = arith.addf %156, %169 : vector<2x8x256xf32>
    %c0_9 = arith.constant 0 : index
    %c0_10 = arith.constant 0 : index
    %c0_11 = arith.constant 0 : index
    %171 = vector.load %arg6[%c0_9, %c0_10, %c0_11] : memref<2x8x256xf32, #tpu.memory_space<vmem>>, vector<2x8x256xf32>
    tpu.vector_store %arg6[%c0_9, %c0_10, %c0_11], %170 {strides = array<i32>} : memref<2x8x256xf32, #tpu.memory_space<vmem>>, vector<2x8x256xf32>,
    return
  }
  func.func @transform_0(%arg0: i32, %arg1: i32) -> (i32, i32, i32) {
    %c0_i32 = arith.constant 0 : i32
    %c0_i32_0 = arith.constant 0 : i32
    %c0_i32_1 = arith.constant 0 : i32
    return %c0_i32, %arg0, %c0_i32_0 : i32, i32, i32
  }
  func.func @transform_1(%arg0: i32, %arg1: i32) -> (i32, i32) {
    %c0_i32 = arith.constant 0 : i32
    %c0_i32_0 = arith.constant 0 : i32
    return %c0_i32, %arg1 : i32, i32
  }
  func.func @transform_2(%arg0: i32, %arg1: i32) -> (i32, i32) {
    %c0_i32 = arith.constant 0 : i32
    return %arg0, %arg1 : i32, i32
  }
  func.func @transform_3(%arg0: i32, %arg1: i32) -> (i32, i32) {
    %c0_i32 = arith.constant 0 : i32
    %c0_i32_0 = arith.constant 0 : i32
    return %c0_i32, %arg1 : i32, i32
  }
  func.func @transform_4(%arg0: i32, %arg1: i32) -> (i32, i32, i32) {
    %c0_i32 = arith.constant 0 : i32
    %c0_i32_0 = arith.constant 0 : i32
    return %c0_i32, %arg0, %arg1 : i32, i32, i32
  }
}

</mosaic_0001>

<bundles_post_ra>
// kernel: tpu_custom_call.1
= control target key start
LH: loop header
LB: loop body
LE: loop exit
PB: predicated region body
PF: predicated region fallthrough
CT: control target
= control target key end

     0   :  { %9 = vsyncpa [#allocation3], 0  ;;  %s883_s0 = inlined_call_operand.vmem [shape: s32[2,8,1], index: 0, kind: input, shape index: {}]   ;;  %s884_s1 = inlined_call_operand.hbm [shape: f32[16,256], index: 1, kind: input, shape index: {}]   ;;  %s885_s2 = inlined_call_operand.hbm [shape: f32[16,256], index: 2, kind: input, shape index: {}]   ;;  %s886_s3 = inlined_call_operand.vmem [shape: f32[1,256], index: 3, kind: input, shape index: {}]   ;;  %s887_s4 = inlined_call_operand.hbm [shape: f32[2,8,256], index: 4, kind: output, shape index: {}]  }
   0x1   :  { %10 = vsyncpa [#allocation6], 0 }
   0x2   :  { %11 = vsyncpa [#allocation4], 0  ;;  %s542_s15 = smov [#allocation2]   ;;  %s470_s19 = scalar_lea.hbm %s884_s1, 512 }
   0x3   :  { %s19_s16 = sshll.u32 %s542_s15, 4  ;;  %p471_p0 = scmp.ne.s32.totalorder %s884_s1, %s470_s19  ;;  %s20_s16 = int_to_ptr.vmem [resolvable:$true] %s19_s16 }
   0x4   :  { %p474_p1 = scmp.lt.u32.totalorder %s470_s19, %s884_s1 }
   0x6   :  { %p476_p2 = pnand %p474_p1, %p471_p0 }
   0x8   :  { %479 = shalt.err (!%p476_p2)
}
   0x9   :  { %s480_s24 = scalar_lea.vmem %s20_s16, 512  ;;  %p485_p4 = scmp.lt.s32.totalorder %s20_s16, %s20_s16 }
   0xa   :  { %p481_p3 = scmp.ne.s32.totalorder %s20_s16, %s480_s24  ;;  %p486_p5 = scmp.lt.s32.totalorder %s480_s24, %s480_s24 }
   0xc   :  { %p487_p6 = por %p486_p5, %p485_p4 }
   0xe   :  { %p488_p7 = pnand %p487_p6, %p481_p3 }
  0x10   :  { %491 = shalt.err (!%p488_p7)
}
  0x11   :  { %s543_s25 = smov 256   ;;  %s544_s26 = smov 16  }
  0x12   :  { %25 = dma.hbm_to_vmem [thread:$0]  %s884_s1, 512, %s20_s16, [#allocation3], %s543_s25, %s543_s25, %s544_s26  }
  0x13   :  { %s545_s29 = smov [#allocation5]   ;;  %s492_s7 = scalar_lea.hbm %s885_s2, 256 }
  0x14   :  { %s32_s30 = sshll.u32 %s545_s29, 4  ;;  %p493_p8 = scmp.ne.s32.totalorder %s885_s2, %s492_s7  ;;  %s33_s30 = int_to_ptr.vmem [resolvable:$true] %s32_s30 }
  0x15   :  { %s494_s12 = scalar_lea.hbm %s885_s2, 512  ;;  %p496_p10 = scmp.lt.u32.totalorder %s492_s7, %s885_s2 }
  0x16   :  { %p495_p9 = scmp.lt.u32.totalorder %s494_s12, %s492_s7 }
  0x18   :  { %p497_p11 = por %p496_p10, %p495_p9 }
  0x1a   :  { %p498_p12 = pnand %p497_p11, %p493_p8 }
  0x1c   :  { %501 = shalt.err (!%p498_p12)
}
  0x1d   :  { %s502_s1 = scalar_lea.vmem %s33_s30, 256  ;;  %p507_p0 = scmp.lt.s32.totalorder %s33_s30, %s33_s30 }
  0x1e   :  { %p503_p13 = scmp.ne.s32.totalorder %s33_s30, %s502_s1  ;;  %p508_p1 = scmp.lt.s32.totalorder %s502_s1, %s502_s1 }
  0x20   :  { %p509_p2 = por %p508_p1, %p507_p0 }
  0x22   :  { %p510_p3 = pnand %p509_p2, %p503_p13 }
  0x24   :  { %513 = shalt.err (!%p510_p3)
}
  0x25   :  { %35 = dma.hbm_to_vmem [thread:$0]  %s885_s2, 256, %s33_s30, [#allocation6]  }
  0x26   :  { %536 = dma.done.wait [#allocation3], 512  }
  0x27   :  { %537 = vsyncadd [#allocation3], 4294966784 }
  0x28   :  { %538 = dma.done.wait [#allocation6], 256  }
  0x29   :  { %539 = vsyncadd [#allocation6], 4294967040  ;;  %v546_v0 = vmov 0   ;;  %v608_v1 = vld [vmem:[%s883_s0] sm:$0xff]  ;;  %v613_v2 = vld [vmem:[%s883_s0 + $0x8] sm:$0xff]  ;;  %v50_v41 = vlaneseq }
  0x2a   :  { %469 = vset.pattern.permute.xlu1 %v546_v0  ;;  %468 = vset.pattern.permute.xlu0 %v546_v0  ;;  %vm82_vm0 = vcmp.eq.s32.totalorder %v608_v1, 2  ;;  %vm58_vm1 = vcmp.eq.s32.totalorder %v608_v1, 1  ;;  %vm83_vm2 = vcmp.eq.s32.totalorder %v613_v2, 2  ;;  %vm59_vm3 = vcmp.eq.s32.totalorder %v613_v2, 1  ;;  %v46_v51 = vld [vmem:[#allocation2] sm:$0xff]  ;;  %v47_v52 = vld [vmem:[#allocation2 + $0x8] sm:$0xff] }
  0x2b   :  { %v84_v3 = vsel %vm82_vm0, 1, %v546_v0  ;;  %v60_v4 = vsel %vm58_vm1, 1, %v546_v0  ;;  %v85_v5 = vsel %vm83_vm2, 1, %v546_v0  ;;  %v61_v6 = vsel %vm59_vm3, 1, %v546_v0 }
  0x2c   :  { %87 = vperm.xlu1 %469, %v84_v3   ;;  %63 = vperm.xlu0 %468, %v60_v4   ;;  %vm107_vm4 = vcmp.eq.s32.totalorder %v613_v2, 3  ;;  %vm106_vm5 = vcmp.eq.s32.totalorder %v608_v1, 3  ;;  %vm131_vm6 = vcmp.eq.s32.totalorder %v613_v2, 4  ;;  %vm130_vm7 = vcmp.eq.s32.totalorder %v608_v1, 4 }
  0x2d   :  { %v109_v7 = vsel %vm107_vm4, 1, %v546_v0  ;;  %v108_v8 = vsel %vm106_vm5, 1, %v546_v0  ;;  %v133_v9 = vsel %vm131_vm6, 1, %v546_v0  ;;  %v132_v10 = vsel %vm130_vm7, 1, %v546_v0 }
  0x2e   :  { %vm155_vm8 = vcmp.eq.s32.totalorder %v613_v2, 5  ;;  %vm154_vm9 = vcmp.eq.s32.totalorder %v608_v1, 5  ;;  %vm179_vm10 = vcmp.eq.s32.totalorder %v613_v2, 6  ;;  %vm178_vm11 = vcmp.eq.s32.totalorder %v608_v1, 6 }
  0x2f   :  { %v157_v11 = vsel %vm155_vm8, 1, %v546_v0  ;;  %v156_v12 = vsel %vm154_vm9, 1, %v546_v0  ;;  %v181_v13 = vsel %vm179_vm10, 1, %v546_v0  ;;  %v180_v14 = vsel %vm178_vm11, 1, %v546_v0 }
  0x30   :  { %90 = vperm.xlu1 %469, %v85_v5   ;;  %66 = vperm.xlu0 %468, %v61_v6   ;;  %vm203_vm12 = vcmp.eq.s32.totalorder %v613_v2, 7  ;;  %vm202_vm13 = vcmp.eq.s32.totalorder %v608_v1, 7  ;;  %vm227_vm14 = vcmp.eq.s32.totalorder %v613_v2, 8  ;;  %vm226_vm15 = vcmp.eq.s32.totalorder %v608_v1, 8  ;;  %v48_v5 = vld [vmem:[#allocation2 + $0x10] sm:$0xff]  ;;  %v49_v6 = vld [vmem:[#allocation2 + $0x18] sm:$0xff] }
  0x31   :  { %v205_v15 = vsel %vm203_vm12, 1, %v546_v0  ;;  %v204_v16 = vsel %vm202_vm13, 1, %v546_v0  ;;  %v229_v17 = vsel %vm227_vm14, 1, %v546_v0  ;;  %v228_v18 = vsel %vm226_vm15, 1, %v546_v0 }
  0x32   :  { %vm251_vm0 = vcmp.eq.s32.totalorder %v613_v2, 9  ;;  %vm250_vm1 = vcmp.eq.s32.totalorder %v608_v1, 9  ;;  %vm275_vm2 = vcmp.eq.s32.totalorder %v613_v2, 10  ;;  %vm274_vm3 = vcmp.eq.s32.totalorder %v608_v1, 10 }
  0x33   :  { %v253_v19 = vsel %vm251_vm0, 1, %v546_v0  ;;  %v252_v20 = vsel %vm250_vm1, 1, %v546_v0  ;;  %v277_v21 = vsel %vm275_vm2, 1, %v546_v0  ;;  %v276_v22 = vsel %vm274_vm3, 1, %v546_v0 }
  0x34   :  { %114 = vperm.xlu1 %469, %v109_v7   ;;  %111 = vperm.xlu0 %468, %v108_v8   ;;  %vm299_vm4 = vcmp.eq.s32.totalorder %v613_v2, 11  ;;  %vm298_vm5 = vcmp.eq.s32.totalorder %v608_v1, 11  ;;  %vm323_vm6 = vcmp.eq.s32.totalorder %v613_v2, 12  ;;  %vm322_vm7 = vcmp.eq.s32.totalorder %v608_v1, 12 }
  0x35   :  { %v301_v23 = vsel %vm299_vm4, 1, %v546_v0  ;;  %v300_v24 = vsel %vm298_vm5, 1, %v546_v0  ;;  %v325_v25 = vsel %vm323_vm6, 1, %v546_v0  ;;  %v324_v26 = vsel %vm322_vm7, 1, %v546_v0 }
  0x36   :  { %vm347_vm8 = vcmp.eq.s32.totalorder %v613_v2, 13  ;;  %vm346_vm9 = vcmp.eq.s32.totalorder %v608_v1, 13  ;;  %vm371_vm10 = vcmp.eq.s32.totalorder %v613_v2, 14  ;;  %vm370_vm11 = vcmp.eq.s32.totalorder %v608_v1, 14 }
  0x37   :  { %v349_v27 = vsel %vm347_vm8, 1, %v546_v0  ;;  %v348_v28 = vsel %vm346_vm9, 1, %v546_v0  ;;  %v373_v29 = vsel %vm371_vm10, 1, %v546_v0  ;;  %v372_v30 = vsel %vm370_vm11, 1, %v546_v0 }
  0x38   :  { %138 = vperm.xlu1 %469, %v133_v9   ;;  %135 = vperm.xlu0 %468, %v132_v10   ;;  %vm395_vm12 = vcmp.eq.s32.totalorder %v613_v2, 15  ;;  %vm394_vm13 = vcmp.eq.s32.totalorder %v608_v1, 15  ;;  %v51_v44 = vshrl.u32 %v50_v41, 7 }
  0x39   :  { %v397_v31 = vsel %vm395_vm12, 1, %v546_v0  ;;  %v396_v32 = vsel %vm394_vm13, 1, %v546_v0 }
  0x3a   :  { %v699_v47 = vsub.s32 0, %v51_v44  ;;  %v701_v48 = vsub.s32 1, %v51_v44  ;;  %v96_v53 = vsub.s32 2, %v51_v44  ;;  %v120_v54 = vsub.s32 3, %v51_v44 }
  0x3b   :  { %v144_v55 = vsub.s32 4, %v51_v44  ;;  %v168_v56 = vsub.s32 5, %v51_v44  ;;  %v192_v57 = vsub.s32 6, %v51_v44  ;;  %v216_v58 = vsub.s32 7, %v51_v44 }
  0x3c   :  { %162 = vperm.xlu1 %469, %v157_v11   ;;  %159 = vperm.xlu0 %468, %v156_v12   ;;  %v53_v59 = vrot.slane %v46_v51, %v699_v47  ;;  %v57_v60 = vrot.slane %v47_v52, %v699_v47  ;;  %v73_v61 = vrot.slane %v46_v51, %v701_v48 }
  0x3d   :  { %v77_v62 = vrot.slane %v47_v52, %v701_v48  ;;  %v97_v1 = vrot.slane %v46_v51, %v96_v53  ;;  %v101_v2 = vrot.slane %v47_v52, %v96_v53  ;;  %v121_v3 = vrot.slane %v46_v51, %v120_v54 }
  0x3e   :  { %v125_v4 = vrot.slane %v47_v52, %v120_v54  ;;  %v145_v7 = vrot.slane %v46_v51, %v144_v55  ;;  %v149_v8 = vrot.slane %v47_v52, %v144_v55  ;;  %v715_v9 = vrot.slane %v46_v51, %v168_v56 }
  0x3f   :  { %v717_v10 = vrot.slane %v47_v52, %v168_v56  ;;  %v719_v11 = vrot.slane %v46_v51, %v192_v57  ;;  %v721_v12 = vrot.slane %v47_v52, %v192_v57 }
  0x40   :  { %186 = vperm.xlu1 %469, %v181_v13   ;;  %183 = vperm.xlu0 %468, %v180_v14   ;;  %v723_v13 = vrot.slane %v46_v51, %v216_v58  ;;  %v725_v14 = vrot.slane %v47_v52, %v216_v58  ;;  %v777_v52 = vrot.slane %v49_v6, %v192_v57 }
  0x44   :  { %210 = vperm.xlu1 %469, %v205_v15   ;;  %207 = vperm.xlu0 %468, %v204_v16   ;;  %v728_v15 = vrot.slane %v48_v5, %v699_v47  ;;  %v731_v16 = vrot.slane %v49_v6, %v699_v47 }
  0x48   :  { %234 = vperm.xlu1 %469, %v229_v17   ;;  %231 = vperm.xlu0 %468, %v228_v18   ;;  %v734_v17 = vrot.slane %v48_v5, %v701_v48  ;;  %v737_v18 = vrot.slane %v49_v6, %v701_v48 }
  0x4c   :  { %258 = vperm.xlu1 %469, %v253_v19   ;;  %255 = vperm.xlu0 %468, %v252_v20  }
  0x50   :  { %282 = vperm.xlu1 %469, %v277_v21   ;;  %279 = vperm.xlu0 %468, %v276_v22   ;;  %v745_v21 = vrot.slane %v48_v5, %v96_v53  ;;  %v747_v22 = vrot.slane %v49_v6, %v96_v53  ;;  %v779_v53 = vrot.slane %v48_v5, %v216_v58 }
  0x54   :  { %306 = vperm.xlu1 %469, %v301_v23   ;;  %303 = vperm.xlu0 %468, %v300_v24   ;;  %v749_v23 = vrot.slane %v48_v5, %v120_v54  ;;  %v751_v24 = vrot.slane %v49_v6, %v120_v54  ;;  %v782_v54 = vrot.slane %v49_v6, %v216_v58 }
  0x58   :  { %330 = vperm.xlu1 %469, %v325_v25   ;;  %327 = vperm.xlu0 %468, %v324_v26   ;;  %v753_v25 = vrot.slane %v48_v5, %v144_v55  ;;  %v755_v26 = vrot.slane %v49_v6, %v144_v55 }
  0x5c   :  { %354 = vperm.xlu1 %469, %v349_v27   ;;  %351 = vperm.xlu0 %468, %v348_v28   ;;  %v758_v27 = vrot.slane %v48_v5, %v168_v56  ;;  %v760_v28 = vrot.slane %v49_v6, %v168_v56 }
  0x60   :  { %378 = vperm.xlu1 %469, %v373_v29   ;;  %375 = vperm.xlu0 %468, %v372_v30   ;;  %v762_v29 = vrot.slane %v48_v5, %v192_v57  ;;  %v420_v30 = vld [vmem:[%s886_s3] sm:$0x3]  ;;  %s547_s3 = smov [#allocation7]  }
  0x61   :  { %v785_v55 = vrot.slane %v420_v30, %v699_v47  ;;  %v788_v56 = vrot.slane %v420_v30, %v701_v48  ;;  %s449_s21 = sshll.u32 %s547_s3, 4  ;;  %s450_s21 = int_to_ptr.vmem [resolvable:$true] %s449_s21 }
  0x62   :  { %s514_s22 = scalar_lea.vmem %s450_s21, 512  ;;  %p519_p5 = scmp.lt.s32.totalorder %s450_s21, %s450_s21 }
  0x63   :  { %p515_p4 = scmp.ne.s32.totalorder %s450_s21, %s514_s22  ;;  %p520_p6 = scmp.lt.s32.totalorder %s514_s22, %s514_s22 }
  0x64   :  { %402 = vperm.xlu1 %469, %v397_v31   ;;  %399 = vperm.xlu0 %468, %v396_v32  }
  0x65   :  { %p521_p7 = por %p520_p6, %p519_p5 }
  0x67   :  { %p522_p8 = pnand %p521_p7, %p515_p4 }
  0xab   :  { %v675_v33 = vpop.permute.xlu1 %87  ;;  %v677_v34 = vpop.permute.xlu0 %63 }
  0xac   :  { %vm68_vm14 = vcmp.eq.s32.totalorder %v677_v34, 1  ;;  %vm92_vm0 = vcmp.eq.s32.totalorder %v675_v33, 1 }
  0xad   :  { %v78_v31 = vsel %vm68_vm14, %v73_v61, %v53_v59  ;;  %v79_v32 = vsel %vm68_vm14, %v77_v62, %v57_v60 }
  0xae   :  { %v103_v57 = vsel %vm92_vm0, %v101_v2, %v79_v32 }
  0xaf   :  { %v679_v35 = vpop.permute.xlu1 %90  ;;  %v681_v36 = vpop.permute.xlu0 %66 }
  0xb0   :  { %vm69_vm15 = vcmp.eq.s32.totalorder %v681_v36, 1  ;;  %vm93_vm1 = vcmp.eq.s32.totalorder %v679_v35, 1 }
  0xb1   :  { %v80_v34 = vsel %vm69_vm15, %v73_v61, %v53_v59  ;;  %v81_v51 = vsel %vm69_vm15, %v77_v62, %v57_v60  ;;  %v102_v59 = vsel %vm92_vm0, %v97_v1, %v78_v31 }
  0xb2   :  { %v104_v36 = vsel %vm93_vm1, %v97_v1, %v80_v34  ;;  %v105_v58 = vsel %vm93_vm1, %v101_v2, %v81_v51 }
  0xb3   :  { %v683_v37 = vpop.permute.xlu1 %114  ;;  %v685_v38 = vpop.permute.xlu0 %111 }
  0xb4   :  { %vm117_vm2 = vcmp.eq.s32.totalorder %v683_v37, 1  ;;  %vm116_vm3 = vcmp.eq.s32.totalorder %v685_v38, 1 }
  0xb5   :  { %v128_v47 = vsel %vm117_vm2, %v121_v3, %v104_v36  ;;  %v129_v61 = vsel %vm117_vm2, %v125_v4, %v105_v58  ;;  %v126_v33 = vsel %vm116_vm3, %v121_v3, %v102_v59  ;;  %v419_v58 = vld [vmem:[#allocation5 + $0x8] sm:$0xff] }
  0xb7   :  { %v687_v39 = vpop.permute.xlu1 %138  ;;  %v689_v40 = vpop.permute.xlu0 %135 }
  0xb8   :  { %vm141_vm4 = vcmp.eq.s32.totalorder %v687_v39, 1  ;;  %vm140_vm5 = vcmp.eq.s32.totalorder %v689_v40, 1  ;;  %v127_v39 = vsel %vm116_vm3, %v125_v4, %v103_v57  ;;  %v418_v57 = vld [vmem:[#allocation5] sm:$0xff] }
  0xb9   :  { %v152_v35 = vsel %vm141_vm4, %v145_v7, %v128_v47  ;;  %v153_v62 = vsel %vm141_vm4, %v149_v8, %v129_v61  ;;  %v150_v40 = vsel %vm140_vm5, %v145_v7, %v126_v33 }
  0xbb   :  { %v691_v42 = vpop.permute.xlu1 %162  ;;  %v693_v43 = vpop.permute.xlu0 %159 }
  0xbc   :  { %vm165_vm6 = vcmp.eq.s32.totalorder %v691_v42, 1  ;;  %vm164_vm7 = vcmp.eq.s32.totalorder %v693_v43, 1  ;;  %v151_v42 = vsel %vm140_vm5, %v149_v8, %v127_v39 }
  0xbd   :  { %v176_v1 = vsel %vm165_vm6, %v715_v9, %v152_v35  ;;  %v177_v37 = vsel %vm165_vm6, %v717_v10, %v153_v62  ;;  %v174_v2 = vsel %vm164_vm7, %v715_v9, %v150_v40  ;;  %v175_v38 = vsel %vm164_vm7, %v717_v10, %v151_v42 }
  0xbf   :  { %v695_v45 = vpop.permute.xlu1 %186  ;;  %v697_v46 = vpop.permute.xlu0 %183 }
  0xc0   :  { %vm189_vm8 = vcmp.eq.s32.totalorder %v695_v45, 1  ;;  %vm188_vm9 = vcmp.eq.s32.totalorder %v697_v46, 1 }
  0xc1   :  { %v200_v45 = vsel %vm189_vm8, %v719_v11, %v176_v1  ;;  %v201_v46 = vsel %vm189_vm8, %v721_v12, %v177_v37  ;;  %v198_v4 = vsel %vm188_vm9, %v719_v11, %v174_v2 }
  0xc3   :  { %v703_v49 = vpop.permute.xlu1 %210  ;;  %v705_v50 = vpop.permute.xlu0 %207 }
  0xc4   :  { %vm213_vm10 = vcmp.eq.s32.totalorder %v703_v49, 1  ;;  %vm212_vm11 = vcmp.eq.s32.totalorder %v705_v50, 1  ;;  %v199_v49 = vsel %vm188_vm9, %v721_v12, %v175_v38 }
  0xc5   :  { %v224_v5 = vsel %vm213_vm10, %v723_v13, %v200_v45  ;;  %v225_v50 = vsel %vm213_vm10, %v725_v14, %v201_v46  ;;  %v222_v6 = vsel %vm212_vm11, %v723_v13, %v198_v4  ;;  %v223_v7 = vsel %vm212_vm11, %v725_v14, %v199_v49 }
  0xc7   :  { %v711_v63 = vpop.permute.xlu1 %234  ;;  %v713_v0 = vpop.permute.xlu0 %231 }
  0xc8   :  { %vm237_vm12 = vcmp.eq.s32.totalorder %v711_v63, 1  ;;  %vm236_vm13 = vcmp.eq.s32.totalorder %v713_v0, 1 }
  0xc9   :  { %v248_v8 = vsel %vm237_vm12, %v728_v15, %v224_v5  ;;  %v249_v63 = vsel %vm237_vm12, %v731_v16, %v225_v50  ;;  %v246_v10 = vsel %vm236_vm13, %v728_v15, %v222_v6  ;;  %v247_v11 = vsel %vm236_vm13, %v731_v16, %v223_v7 }
  0xcb   :  { %v739_v19 = vpop.permute.xlu1 %258  ;;  %v741_v20 = vpop.permute.xlu0 %255 }
  0xcc   :  { %vm261_vm14 = vcmp.eq.s32.totalorder %v739_v19, 1  ;;  %vm260_vm15 = vcmp.eq.s32.totalorder %v741_v20, 1 }
  0xcd   :  { %v272_v12 = vsel %vm261_vm14, %v734_v17, %v248_v8  ;;  %v273_v13 = vsel %vm261_vm14, %v737_v18, %v249_v63  ;;  %v270_v14 = vsel %vm260_vm15, %v734_v17, %v246_v10  ;;  %v271_v19 = vsel %vm260_vm15, %v737_v18, %v247_v11 }
  0xcf   :  { %v770_v41 = vpop.permute.xlu1 %282  ;;  %v772_v44 = vpop.permute.xlu0 %279 }
  0xd0   :  { %vm285_vm0 = vcmp.eq.s32.totalorder %v770_v41, 1  ;;  %vm284_vm1 = vcmp.eq.s32.totalorder %v772_v44, 1 }
  0xd1   :  { %v296_v20 = vsel %vm285_vm0, %v745_v21, %v272_v12  ;;  %v297_v30 = vsel %vm285_vm0, %v747_v22, %v273_v13  ;;  %v294_v31 = vsel %vm284_vm1, %v745_v21, %v270_v14  ;;  %v295_v15 = vsel %vm284_vm1, %v747_v22, %v271_v19 }
  0xd3   :  { %v307_v48 = vpop.permute.xlu1 %306  ;;  %v304_v60 = vpop.permute.xlu0 %303 }
  0xd4   :  { %vm309_vm2 = vcmp.eq.s32.totalorder %v307_v48, 1  ;;  %vm308_vm3 = vcmp.eq.s32.totalorder %v304_v60, 1 }
  0xd5   :  { %v320_v16 = vsel %vm309_vm2, %v749_v23, %v296_v20  ;;  %v321_v17 = vsel %vm309_vm2, %v751_v24, %v297_v30  ;;  %v318_v18 = vsel %vm308_vm3, %v749_v23, %v294_v31  ;;  %v319_v41 = vsel %vm308_vm3, %v751_v24, %v295_v15 }
  0xd7   :  { %v331_v43 = vpop.permute.xlu1 %330  ;;  %v328_v3 = vpop.permute.xlu0 %327 }
  0xd8   :  { %vm333_vm4 = vcmp.eq.s32.totalorder %v331_v43, 1  ;;  %vm332_vm5 = vcmp.eq.s32.totalorder %v328_v3, 1 }
  0xd9   :  { %v344_v44 = vsel %vm333_vm4, %v753_v25, %v320_v16  ;;  %v345_v21 = vsel %vm333_vm4, %v755_v26, %v321_v17  ;;  %v342_v22 = vsel %vm332_vm5, %v753_v25, %v318_v18  ;;  %v343_v51 = vsel %vm332_vm5, %v755_v26, %v319_v41 }
  0xdb   :  { %v355_v9 = vpop.permute.xlu1 %354  ;;  %v352_v0 = vpop.permute.xlu0 %351 }
  0xdc   :  { %vm357_vm6 = vcmp.eq.s32.totalorder %v355_v9, 1  ;;  %vm356_vm7 = vcmp.eq.s32.totalorder %v352_v0, 1 }
  0xdd   :  { %v368_v36 = vsel %vm357_vm6, %v758_v27, %v344_v44  ;;  %v369_v59 = vsel %vm357_vm6, %v760_v28, %v345_v21  ;;  %v366_v23 = vsel %vm356_vm7, %v758_v27, %v342_v22  ;;  %v367_v47 = vsel %vm356_vm7, %v760_v28, %v343_v51 }
  0xdf   :  { %v379_v32 = vpop.permute.xlu1 %378  ;;  %v376_v34 = vpop.permute.xlu0 %375 }
  0xe0   :  { %vm381_vm8 = vcmp.eq.s32.totalorder %v379_v32, 1  ;;  %vm380_vm9 = vcmp.eq.s32.totalorder %v376_v34, 1 }
  0xe1   :  { %v392_v24 = vsel %vm381_vm8, %v762_v29, %v368_v36  ;;  %v393_v48 = vsel %vm381_vm8, %v777_v52, %v369_v59  ;;  %v390_v25 = vsel %vm380_vm9, %v762_v29, %v366_v23  ;;  %v391_v26 = vsel %vm380_vm9, %v777_v52, %v367_v47 }
  0xe3   :  { %v403_v60 = vpop.permute.xlu1 %402  ;;  %v400_v61 = vpop.permute.xlu0 %399 }
  0xe4   :  { %vm405_vm10 = vcmp.eq.s32.totalorder %v403_v60, 1  ;;  %vm404_vm11 = vcmp.eq.s32.totalorder %v400_v61, 1 }
  0xe5   :  { %v416_v33 = vsel %vm405_vm10, %v779_v53, %v392_v24  ;;  %v417_v39 = vsel %vm405_vm10, %v782_v54, %v393_v48  ;;  %v434_v27 = vsel %vm405_vm10, %v785_v55, %v418_v57  ;;  %v435_v28 = vsel %vm405_vm10, %v788_v56, %v419_v58 }
  0xe6   :  { %v438_v35 = vadd.f32 %v434_v27, %v416_v33  ;;  %v439_v62 = vadd.f32 %v435_v28, %v417_v39  ;;  %v414_v40 = vsel %vm404_vm11, %v779_v53, %v390_v25  ;;  %v415_v29 = vsel %vm404_vm11, %v782_v54, %v391_v26 }
  0xe7   :  { %v432_v52 = vsel %vm404_vm11, %v785_v55, %v418_v57  ;;  %v433_v42 = vsel %vm404_vm11, %v788_v56, %v419_v58 }
  0xe8   :  { %442 = vst [vmem:[#allocation7 + $0x10] sm:$0xff] %v438_v35  ;;  %443 = vst [vmem:[#allocation7 + $0x18] sm:$0xff] %v439_v62  ;;  %v436_v1 = vadd.f32 %v432_v52, %v414_v40  ;;  %v437_v37 = vadd.f32 %v433_v42, %v415_v29 }
  0xea   :  { %440 = vst [vmem:[#allocation7] sm:$0xff] %v436_v1  ;;  %441 = vst [vmem:[#allocation7 + $0x8] sm:$0xff] %v437_v37 }
  0xeb   :  { %525 = shalt.err (!%p522_p8)
}
  0xec   :  { %s526_s27 = scalar_lea.hbm %s887_s4, 512 }
  0xed   :  { %p527_p9 = scmp.ne.s32.totalorder %s887_s4, %s526_s27  ;;  %p530_p10 = scmp.lt.u32.totalorder %s526_s27, %s887_s4 }
  0xef   :  { %p532_p11 = pnand %p530_p10, %p527_p9 }
  0xf1   :  { %535 = shalt.err (!%p532_p11)
}
  0xf2   :  { %455 = dma.vmem_to_hbm [thread:$0]  %s450_s21, 512, %s887_s4, [#allocation4], %s543_s25, %s543_s25, %s544_s26  }
  0xf3   :  { %540 = dma.done.wait [#allocation4], 512  }
  0xf4   :  { %541 = vsyncadd [#allocation4], 4294966784 }
  0xf5   :  { %459 = vsyncpa [#allocation3], 1 }
  0xf6   :  { %460 = vsyncpa [#allocation6], 1 }
  0xf7   :  { %461 = vsyncpa [#allocation4], 1 }

</bundles_post_ra>
